<compile_context>
chip_gen: v7x
topology: tpu7x:2x2x1
jax: 0.10.0
libtpu: 0.0.40
codegen_flags: <defaults>
</compile_context>

<pallas_src>
import functools

import jax
import jax.numpy as jnp
from jax.experimental import pallas as pl
from jax.experimental.pallas import tpu as pltpu


def vae_kernel(x_ref, eps_ref,
               w1_ref, b1_ref,
               wmulv_ref, bmulv_ref,
               w3_ref, b3_ref,
               w4_ref, b4_ref,
               xs_ref, mulv_ref):
    x = x_ref[...]                                        # (TB, D) f32
    eps = eps_ref[...]                                    # (TB, Z) f32
    Z = eps.shape[-1]
    wdt = w1_ref.dtype                                    # MXU operand dtype

    # --- encoder ---
    h = jnp.dot(x.astype(wdt), w1_ref[...],
                preferred_element_type=jnp.float32)
    h = jnp.maximum(h + b1_ref[...], 0.0)                 # bias + ReLU in f32

    # fused mu|logvar projection, zero-padded to a 128-lane multiple in the
    # wrapper -> one MXU push and a lane-dense latent store below.
    mulv = jnp.dot(h.astype(wdt), wmulv_ref[...],
                   preferred_element_type=jnp.float32) + bmulv_ref[...]
    z_mu = mulv[:, :Z]
    z_logvar = mulv[:, Z:2 * Z]

    # --- reparametrize:  z = mu + exp(0.5 * logvar) * eps ---
    z = z_mu + jnp.exp(0.5 * z_logvar) * eps              # (TB, Z) f32

    # --- decoder ---
    h2 = jnp.dot(z.astype(wdt), w3_ref[...],
                 preferred_element_type=jnp.float32)
    h2 = jnp.maximum(h2 + b3_ref[...], 0.0)
    logits = jnp.dot(h2.astype(wdt), w4_ref[...],
                     preferred_element_type=jnp.float32) + b4_ref[...]

    # exact sigmoid with a single EUP transcendental on the widest tensor:
    # sigmoid(x) = 0.5 * tanh(0.5 * x) + 0.5
    xs_ref[...] = (0.5 * jnp.tanh(0.5 * logits) + 0.5).astype(xs_ref.dtype)
    mulv_ref[...] = mulv.astype(mulv_ref.dtype)           # packed (mu | logvar)


def _round_up(x, m):
    return (x + m - 1) // m * m


def _vmem_limit_bytes(D, H, Z, lat, tb, w_itemsize):
    # weights/biases (worst case: double-buffered even though their block
    # index never changes) + double-buffered batch tiles + intermediates.
    w_bytes = (D * H + H * lat + Z * H + H * D) * w_itemsize * 2
    b_bytes = (H + lat + H + D) * 4 * 2
    tile_bytes = (tb * (D + Z) + tb * (D + lat)) * 4 * 2
    interm_bytes = tb * (H + lat + Z + H + D) * 4
    need = w_bytes + b_bytes + tile_bytes + interm_bytes
    # 2x headroom, 16 MiB floor (<= every generation's scoped default region),
    # capped at 56 MiB so we never request v7x's full 64 MiB/TC.
    return int(min(56 << 20, max(16 << 20, 2 * need)))


def vae_forward(x_nchw, eps, params, *, compute_dtype=jnp.bfloat16, tb=None):
    """x_nchw: (B, C, H, W) float32; eps: (B, Z) float32.

    Returns (x_sample, z_mu, z_logvar), each with leading dim B.
    compute_dtype: dtype fed to the MXU dots (bf16 default; elementwise math
    and accumulation always stay f32).
    """
    B = x_nchw.shape[0]
    D = x_nchw.shape[1] * x_nchw.shape[2] * x_nchw.shape[3]
    x = x_nchw.reshape(B, D).astype(jnp.float32)          # glue: flatten NCHW

    (w1, b1, wmu, bmu, wlv, blv, w3, b3, w4, b4) = params
    H = w1.shape[1]
    Z = wmu.shape[1]
    LAT = _round_up(2 * Z, 128)                           # lane-dense packed width

    # fuse the two latent projections into one (H, LAT) weight / (1, LAT) bias,
    # zero-padded to a 128-lane multiple (lane-dense latent store).
    wmulv = jnp.zeros((H, LAT), jnp.float32)
    wmulv = wmulv.at[:, :Z].set(wmu).at[:, Z:2 * Z].set(wlv)
    bmulv = jnp.zeros((1, LAT), jnp.float32)
    bmulv = bmulv.at[:, :Z].set(bmu).at[:, Z:2 * Z].set(blv)

    # MXU operands in compute_dtype; biases stay f32 for the f32 epilogue.
    w1c, wmulvc = w1.astype(compute_dtype), wmulv.astype(compute_dtype)
    w3c, w4c = w3.astype(compute_dtype), w4.astype(compute_dtype)
    b1f, bmulvf = b1.astype(jnp.float32), bmulv
    b3f, b4f = b3.astype(jnp.float32), b4.astype(jnp.float32)

    # --- batch tiling ---
    # Large tiles (HBM-bound kernel) but at least 2 grid steps for large B so
    # both v7x TensorCores are used.  No padding of x/eps and no output
    # slicing: the ragged last block is handled by Pallas (masked stores).
    if tb is None:
        if B <= 8:
            tb = B                          # single block == full array dim
        else:
            tb = min(1024, _round_up((B + 1) // 2, 8))
    grid_b = pl.cdiv(B, tb)

    batch_spec = lambda n: pl.BlockSpec((tb, n), lambda i: (i, 0))
    const_spec = lambda shape: pl.BlockSpec(shape, lambda i: (0, 0))

    out_shapes = (
        jax.ShapeDtypeStruct((B, D), jnp.float32),        # x_sample
        jax.ShapeDtypeStruct((B, LAT), jnp.float32),      # mu | logvar packed
    )

    fn = pl.pallas_call(
        vae_kernel,
        out_shape=out_shapes,
        grid=(grid_b,),
        in_specs=[
            batch_spec(D),              # x
            batch_spec(Z),              # eps
            const_spec((D, H)),         # w1     (VMEM-resident across steps)
            const_spec((1, H)),         # b1
            const_spec((H, LAT)),       # wmu|wlv fused, lane-padded
            const_spec((1, LAT)),       # bmu|blv fused, lane-padded
            const_spec((Z, H)),         # w3
            const_spec((1, H)),         # b3
            const_spec((H, D)),         # w4
            const_spec((1, D)),         # b4
        ],
        out_specs=(batch_spec(D), batch_spec(LAT)),
        compiler_params=pltpu.CompilerParams(
            dimension_semantics=("parallel",),
            vmem_limit_bytes=_vmem_limit_bytes(
                D, H, Z, LAT, tb, jnp.dtype(compute_dtype).itemsize),
        ),
    )
    xs, mulv = fn(x, eps.astype(jnp.float32),
                  w1c, b1f, wmulvc, bmulvf, w3c, b3f, w4c, b4f)

    return xs, mulv[:, :Z], mulv[:, Z:2 * Z]


def init_params(key, D, H, Z):
    ks = jax.random.split(key, 10)
    scale = 0.05
    w1 = scale * jax.random.normal(ks[0], (D, H), jnp.float32)
    b1 = scale * jax.random.normal(ks[1], (1, H), jnp.float32)
    wmu = scale * jax.random.normal(ks[2], (H, Z), jnp.float32)
    bmu = scale * jax.random.normal(ks[3], (1, Z), jnp.float32)
    wlv = scale * jax.random.normal(ks[4], (H, Z), jnp.float32)
    blv = scale * jax.random.normal(ks[5], (1, Z), jnp.float32)
    w3 = scale * jax.random.normal(ks[6], (Z, H), jnp.float32)
    b3 = scale * jax.random.normal(ks[7], (1, H), jnp.float32)
    w4 = scale * jax.random.normal(ks[8], (H, D), jnp.float32)
    b4 = scale * jax.random.normal(ks[9], (1, D), jnp.float32)
    return (w1, b1, wmu, bmu, wlv, blv, w3, b3, w4, b4)


def vae_reference(x_nchw, eps, params):
    B = x_nchw.shape[0]
    D = x_nchw.shape[1] * x_nchw.shape[2] * x_nchw.shape[3]
    xf = x_nchw.reshape(B, D)
    (w1, b1, wmu, bmu, wlv, blv, w3, b3, w4, b4) = params
    dot = functools.partial(jnp.dot, precision=jax.lax.Precision.HIGHEST)
    h = jnp.maximum(dot(xf, w1) + b1, 0.0)
    mu = dot(h, wmu) + bmu
    lv = dot(h, wlv) + blv
    z = mu + jnp.exp(0.5 * lv) * eps
    h2 = jnp.maximum(dot(z, w3) + b3, 0.0)
    xs = jax.nn.sigmoid(dot(h2, w4) + b4)
    return xs, mu, lv


if __name__ == "__main__":
    B, C, Himg, Wimg = 2, 4, 16, 16
    D = C * Himg * Wimg          # 1024
    H = 32                       # hidden width
    Z = 8                        # latent dim

    key = jax.random.PRNGKey(0)
    k_x, k_eps, k_params, k_x2, k_eps2 = jax.random.split(key, 5)

    params = init_params(k_params, D, H, Z)

    # --- small-batch run (B=2), f32 MXU operands -> tight numerics check ---
    x = jax.random.uniform(k_x, (B, C, Himg, Wimg), jnp.float32)
    # TODO(synk): eps could be generated in-kernel via pltpu.prng_seed /
    # pltpu.stateful_normal; kept external for deterministic testing.
    eps = jax.random.normal(k_eps, (B, Z), jnp.float32)

    xs, mu, lv = vae_forward(x, eps, params, compute_dtype=jnp.float32)
    jax.block_until_ready((xs, mu, lv))

    xs_ref, mu_ref, lv_ref = vae_reference(x, eps, params)
    assert xs.shape == (B, D) and mu.shape == (B, Z) and lv.shape == (B, Z)
    assert jnp.allclose(mu, mu_ref, atol=2e-3, rtol=1e-3)
    assert jnp.allclose(lv, lv_ref, atol=2e-3, rtol=1e-3)
    assert jnp.allclose(xs, xs_ref, atol=2e-3)

    # --- larger, non-tile-multiple batch with default bf16 MXU operands ---
    # exercises the multi-step "parallel" grid and the ragged last block.
    B2 = 300
    x2 = jax.random.uniform(k_x2, (B2, C, Himg, Wimg), jnp.float32)
    eps2 = jax.random.normal(k_eps2, (B2, Z), jnp.float32)
    xs2, mu2, lv2 = vae_forward(x2, eps2, params)
    jax.block_until_ready((xs2, mu2, lv2))

    xs2_ref, mu2_ref, lv2_ref = vae_reference(x2, eps2, params)
    assert xs2.shape == (B2, D) and mu2.shape == (B2, Z) and lv2.shape == (B2, Z)
    # bf16 MXU operands: loosen tolerances (f32 accumulation, ~1e-3 expected)
    assert jnp.allclose(mu2, mu2_ref, atol=5e-2, rtol=5e-2)
    assert jnp.allclose(lv2, lv2_ref, atol=5e-2, rtol=5e-2)
    assert jnp.allclose(xs2, xs2_ref, atol=2e-2)

    print("KERNEL_OK")
</pallas_src>

<mosaic_0001>
module attributes {stable_mosaic.version = 11 : i64} {
  func.func @vae_kernel(%arg0: i32, %arg1: memref<2x1024xf32, #tpu.memory_space<vmem>>, %arg2: memref<2x8xf32, #tpu.memory_space<vmem>>, %arg3: memref<1024x32xf32, #tpu.memory_space<vmem>>, %arg4: memref<1x32xf32, #tpu.memory_space<vmem>>, %arg5: memref<32x128xf32, #tpu.memory_space<vmem>>, %arg6: memref<1x128xf32, #tpu.memory_space<vmem>>, %arg7: memref<8x32xf32, #tpu.memory_space<vmem>>, %arg8: memref<1x32xf32, #tpu.memory_space<vmem>>, %arg9: memref<32x1024xf32, #tpu.memory_space<vmem>>, %arg10: memref<1x1024xf32, #tpu.memory_space<vmem>>, %arg11: memref<2x1024xf32, #tpu.memory_space<vmem>>, %arg12: memref<2x128xf32, #tpu.memory_space<vmem>>) attributes {dimension_semantics = [#tpu.dimension_semantics<parallel>], iteration_bounds = array<i64: 1>, scalar_prefetch = 0 : i64, scratch_operands = 0 : i64, tpu.core_type = #tpu.core_type<tc>, window_params = [{transform_indices = @transform_0, window_bounds = array<i64: 2, 1024>}, {transform_indices = @transform_1, window_bounds = array<i64: 2, 8>}, {pipeline_mode = #tpu.pipeline_mode<synchronous>, transform_indices = @transform_2, window_bounds = array<i64: 1024, 32>}, {pipeline_mode = #tpu.pipeline_mode<synchronous>, transform_indices = @transform_3, window_bounds = array<i64: 1, 32>}, {pipeline_mode = #tpu.pipeline_mode<synchronous>, transform_indices = @transform_4, window_bounds = array<i64: 32, 128>}, {pipeline_mode = #tpu.pipeline_mode<synchronous>, transform_indices = @transform_5, window_bounds = array<i64: 1, 128>}, {pipeline_mode = #tpu.pipeline_mode<synchronous>, transform_indices = @transform_6, window_bounds = array<i64: 8, 32>}, {pipeline_mode = #tpu.pipeline_mode<synchronous>, transform_indices = @transform_7, window_bounds = array<i64: 1, 32>}, {pipeline_mode = #tpu.pipeline_mode<synchronous>, transform_indices = @transform_8, window_bounds = array<i64: 32, 1024>}, {pipeline_mode = #tpu.pipeline_mode<synchronous>, transform_indices = @transform_9, window_bounds = array<i64: 1, 1024>}, {transform_indices = @transform_10, window_bounds = array<i64: 2, 1024>}, {transform_indices = @transform_11, window_bounds = array<i64: 2, 128>}]} {
    %c0 = arith.constant 0 : index
    %c0_0 = arith.constant 0 : index
    %0 = vector.load %arg1[%c0, %c0_0] : memref<2x1024xf32, #tpu.memory_space<vmem>>, vector<2x1024xf32>
    %c0_1 = arith.constant 0 : index
    %c0_2 = arith.constant 0 : index
    %1 = vector.load %arg2[%c0_1, %c0_2] : memref<2x8xf32, #tpu.memory_space<vmem>>, vector<2x8xf32>
    %c0_3 = arith.constant 0 : index
    %c0_4 = arith.constant 0 : index
    %2 = vector.load %arg3[%c0_3, %c0_4] : memref<1024x32xf32, #tpu.memory_space<vmem>>, vector<1024x32xf32>
    %cst = arith.constant dense<0.000000e+00> : vector<2x32xf32>
    %3 = tpu.matmul %0, %2, %cst {dimension_numbers = #tpu.dot_dimension_numbers<[1], [0], [0], [1], [0, 0, 1, 1], [], []>} : vector<2x1024xf32>, vector<1024x32xf32>, vector<2x32xf32> -> vector<2x32xf32>
    %c0_5 = arith.constant 0 : index
    %c0_6 = arith.constant 0 : index
    %4 = vector.load %arg4[%c0_5, %c0_6] : memref<1x32xf32, #tpu.memory_space<vmem>>, vector<1x32xf32>
    %5 = vector.broadcast %4 : vector<1x32xf32> to vector<2x32xf32>
    %6 = arith.addf %3, %5 : vector<2x32xf32>
    %cst_7 = arith.constant 0.000000e+00 : f32
    %7 = vector.broadcast %cst_7 : f32 to vector<2x32xf32>
    %8 = arith.maximumf %6, %7 : vector<2x32xf32>
    %c0_8 = arith.constant 0 : index
    %c0_9 = arith.constant 0 : index
    %9 = vector.load %arg5[%c0_8, %c0_9] : memref<32x128xf32, #tpu.memory_space<vmem>>, vector<32x128xf32>
    %cst_10 = arith.constant dense<0.000000e+00> : vector<2x128xf32>
    %10 = tpu.matmul %8, %9, %cst_10 {dimension_numbers = #tpu.dot_dimension_numbers<[1], [0], [0], [1], [0, 0, 1, 1], [], []>} : vector<2x32xf32>, vector<32x128xf32>, vector<2x128xf32> -> vector<2x128xf32>
    %c0_11 = arith.constant 0 : index
    %c0_12 = arith.constant 0 : index
    %11 = vector.load %arg6[%c0_11, %c0_12] : memref<1x128xf32, #tpu.memory_space<vmem>>, vector<1x128xf32>
    %12 = vector.broadcast %11 : vector<1x128xf32> to vector<2x128xf32>
    %13 = arith.addf %10, %12 : vector<2x128xf32>
    %14 = vector.extract_strided_slice %13 {offsets = [0, 0], sizes = [2, 8], strides = [1, 1]} : vector<2x128xf32> to vector<2x8xf32>
    %15 = vector.extract_strided_slice %13 {offsets = [0, 8], sizes = [2, 8], strides = [1, 1]} : vector<2x128xf32> to vector<2x8xf32>
    %cst_13 = arith.constant 5.000000e-01 : f32
    %16 = vector.broadcast %cst_13 : f32 to vector<2x8xf32>
    %17 = arith.mulf %16, %15 : vector<2x8xf32>
    %18 = math.exp %17 : vector<2x8xf32>
    %19 = arith.mulf %18, %1 : vector<2x8xf32>
    %20 = arith.addf %14, %19 : vector<2x8xf32>
    %c0_14 = arith.constant 0 : index
    %c0_15 = arith.constant 0 : index
    %21 = vector.load %arg7[%c0_14, %c0_15] : memref<8x32xf32, #tpu.memory_space<vmem>>, vector<8x32xf32>
    %cst_16 = arith.constant dense<0.000000e+00> : vector<2x32xf32>
    %22 = tpu.matmul %20, %21, %cst_16 {dimension_numbers = #tpu.dot_dimension_numbers<[1], [0], [0], [1], [0, 0, 1, 1], [], []>} : vector<2x8xf32>, vector<8x32xf32>, vector<2x32xf32> -> vector<2x32xf32>
    %c0_17 = arith.constant 0 : index
    %c0_18 = arith.constant 0 : index
    %23 = vector.load %arg8[%c0_17, %c0_18] : memref<1x32xf32, #tpu.memory_space<vmem>>, vector<1x32xf32>
    %24 = vector.broadcast %23 : vector<1x32xf32> to vector<2x32xf32>
    %25 = arith.addf %22, %24 : vector<2x32xf32>
    %cst_19 = arith.constant 0.000000e+00 : f32
    %26 = vector.broadcast %cst_19 : f32 to vector<2x32xf32>
    %27 = arith.maximumf %25, %26 : vector<2x32xf32>
    %c0_20 = arith.constant 0 : index
    %c0_21 = arith.constant 0 : index
    %28 = vector.load %arg9[%c0_20, %c0_21] : memref<32x1024xf32, #tpu.memory_space<vmem>>, vector<32x1024xf32>
    %cst_22 = arith.constant dense<0.000000e+00> : vector<2x1024xf32>
    %29 = tpu.matmul %27, %28, %cst_22 {dimension_numbers = #tpu.dot_dimension_numbers<[1], [0], [0], [1], [0, 0, 1, 1], [], []>} : vector<2x32xf32>, vector<32x1024xf32>, vector<2x1024xf32> -> vector<2x1024xf32>
    %c0_23 = arith.constant 0 : index
    %c0_24 = arith.constant 0 : index
    %30 = vector.load %arg10[%c0_23, %c0_24] : memref<1x1024xf32, #tpu.memory_space<vmem>>, vector<1x1024xf32>
    %31 = vector.broadcast %30 : vector<1x1024xf32> to vector<2x1024xf32>
    %32 = arith.addf %29, %31 : vector<2x1024xf32>
    %cst_25 = arith.constant 5.000000e-01 : f32
    %33 = vector.broadcast %cst_25 : f32 to vector<2x1024xf32>
    %34 = arith.mulf %33, %32 : vector<2x1024xf32>
    %35 = math.tanh %34 : vector<2x1024xf32>
    %cst_26 = arith.constant 5.000000e-01 : f32
    %36 = vector.broadcast %cst_26 : f32 to vector<2x1024xf32>
    %37 = arith.mulf %36, %35 : vector<2x1024xf32>
    %cst_27 = arith.constant 5.000000e-01 : f32
    %38 = vector.broadcast %cst_27 : f32 to vector<2x1024xf32>
    %39 = arith.addf %37, %38 : vector<2x1024xf32>
    %c0_28 = arith.constant 0 : index
    %c0_29 = arith.constant 0 : index
    %40 = vector.load %arg11[%c0_28, %c0_29] : memref<2x1024xf32, #tpu.memory_space<vmem>>, vector<2x1024xf32>
    tpu.vector_store %arg11[%c0_28, %c0_29], %39 {strides = array<i32>} : memref<2x1024xf32, #tpu.memory_space<vmem>>, vector<2x1024xf32>,
    %c0_30 = arith.constant 0 : index
    %c0_31 = arith.constant 0 : index
    %41 = vector.load %arg12[%c0_30, %c0_31] : memref<2x128xf32, #tpu.memory_space<vmem>>, vector<2x128xf32>
    tpu.vector_store %arg12[%c0_30, %c0_31], %13 {strides = array<i32>} : memref<2x128xf32, #tpu.memory_space<vmem>>, vector<2x128xf32>,
    return
  }
  func.func @transform_0(%arg0: i32) -> (i32, i32) {
    %c0_i32 = arith.constant 0 : i32
    %c0_i32_0 = arith.constant 0 : i32
    return %arg0, %c0_i32 : i32, i32
  }
  func.func @transform_1(%arg0: i32) -> (i32, i32) {
    %c0_i32 = arith.constant 0 : i32
    %c0_i32_0 = arith.constant 0 : i32
    return %arg0, %c0_i32 : i32, i32
  }
  func.func @transform_2(%arg0: i32) -> (i32, i32) {
    %c0_i32 = arith.constant 0 : i32
    %c0_i32_0 = arith.constant 0 : i32
    %c0_i32_1 = arith.constant 0 : i32
    return %c0_i32, %c0_i32_0 : i32, i32
  }
  func.func @transform_3(%arg0: i32) -> (i32, i32) {
    %c0_i32 = arith.constant 0 : i32
    %c0_i32_0 = arith.constant 0 : i32
    %c0_i32_1 = arith.constant 0 : i32
    return %c0_i32, %c0_i32_0 : i32, i32
  }
  func.func @transform_4(%arg0: i32) -> (i32, i32) {
    %c0_i32 = arith.constant 0 : i32
    %c0_i32_0 = arith.constant 0 : i32
    %c0_i32_1 = arith.constant 0 : i32
    return %c0_i32, %c0_i32_0 : i32, i32
  }
  func.func @transform_5(%arg0: i32) -> (i32, i32) {
    %c0_i32 = arith.constant 0 : i32
    %c0_i32_0 = arith.constant 0 : i32
    %c0_i32_1 = arith.constant 0 : i32
    return %c0_i32, %c0_i32_0 : i32, i32
  }
  func.func @transform_6(%arg0: i32) -> (i32, i32) {
    %c0_i32 = arith.constant 0 : i32
    %c0_i32_0 = arith.constant 0 : i32
    %c0_i32_1 = arith.constant 0 : i32
    return %c0_i32, %c0_i32_0 : i32, i32
  }
  func.func @transform_7(%arg0: i32) -> (i32, i32) {
    %c0_i32 = arith.constant 0 : i32
    %c0_i32_0 = arith.constant 0 : i32
    %c0_i32_1 = arith.constant 0 : i32
    return %c0_i32, %c0_i32_0 : i32, i32
  }
  func.func @transform_8(%arg0: i32) -> (i32, i32) {
    %c0_i32 = arith.constant 0 : i32
    %c0_i32_0 = arith.constant 0 : i32
    %c0_i32_1 = arith.constant 0 : i32
    return %c0_i32, %c0_i32_0 : i32, i32
  }
  func.func @transform_9(%arg0: i32) -> (i32, i32) {
    %c0_i32 = arith.constant 0 : i32
    %c0_i32_0 = arith.constant 0 : i32
    %c0_i32_1 = arith.constant 0 : i32
    return %c0_i32, %c0_i32_0 : i32, i32
  }
  func.func @transform_10(%arg0: i32) -> (i32, i32) {
    %c0_i32 = arith.constant 0 : i32
    %c0_i32_0 = arith.constant 0 : i32
    return %arg0, %c0_i32 : i32, i32
  }
  func.func @transform_11(%arg0: i32) -> (i32, i32) {
    %c0_i32 = arith.constant 0 : i32
    %c0_i32_0 = arith.constant 0 : i32
    return %arg0, %c0_i32 : i32, i32
  }
}

</mosaic_0001>

<bundles_post_ra>
// kernel: tpu_custom_call.1
= control target key start
LH: loop header
LB: loop body
LE: loop exit
PB: predicated region body
PF: predicated region fallthrough
CT: control target
= control target key end

     0   :  { %17 = vsyncpa [#allocation3], 0  ;;  %v1565_v47 = vmov 1983009808   ;;  %v183_v49 = vlaneseq  ;;  %s2211_s0 = inlined_call_operand.vmem [shape: f32[2,1024], index: 0, kind: input, shape index: {}]   ;;  %s2212_s1 = inlined_call_operand.vmem [shape: f32[2,8], index: 1, kind: input, shape index: {}]   ;;  %s2213_s2 = inlined_call_operand.vmem [shape: f32[1024,32], index: 2, kind: input, shape index: {}]   ;;  %s2214_s3 = inlined_call_operand.vmem [shape: f32[1,32], index: 3, kind: input, shape index: {}]   ;;  %s2215_s4 = inlined_call_operand.vmem [shape: f32[32,128], index: 4, kind: input, shape index: {}]   ;;  %s2216_s5 = inlined_call_operand.vmem [shape: f32[1,128], index: 5, kind: input, shape index: {}]   ;;  %s2217_s6 = inlined_call_operand.vmem [shape: f32[8,32], index: 6, kind: input, shape index: {}]   ;;  %s2218_s7 = inlined_call_operand.vmem [shape: f32[1,32], index: 7, kind: input, shape index: {}]   ;;  %s2219_s8 = inlined_call_operand.vmem [shape: f32[32,1024], index: 8, kind: input, shape index: {}]   ;;  %s2220_s9 = inlined_call_operand.vmem [shape: f32[1,1024], index: 9, kind: input, shape index: {}]   ;;  %s2221_s10 = inlined_call_operand.hbm [shape: f32[2,1024], index: 10, kind: output, shape index: {0}]   ;;  %s2222_s11 = inlined_call_operand.hbm [shape: f32[2,128], index: 11, kind: output, shape index: {1}]  }
   0x1   :  { %v58_v0 = vld [vmem:[%s2213_s2 + $0x80] sm:$0xff]  ;;  %v59_v1 = vld [vmem:[%s2213_s2 + $0x88] sm:$0xff]  ;;  %v60_v11 = vld [vmem:[%s2213_s2 + $0x90] sm:$0xff]  ;;  %v181_v48 = vunpack.c.l.s4 %v1565_v47 }
   0x2   :  { %v42_v2 = vld [vmem:[%s2213_s2] sm:$0xff]  ;;  %v1323_v3 = vpack.c.bf16 %v59_v1, %v58_v0  ;;  %v43_v4 = vld [vmem:[%s2213_s2 + $0x8] sm:$0xff]  ;;  %v61_v13 = vld [vmem:[%s2213_s2 + $0x98] sm:$0xff]  ;;  %v1759_v0 = vshrl.u32 %v183_v49, 7 }
   0x3   :  { %v90_v5 = vld [vmem:[%s2213_s2 + $0x180] sm:$0xff]  ;;  %v91_v6 = vld [vmem:[%s2213_s2 + $0x188] sm:$0xff]  ;;  %v1325_v7 = vpack.c.bf16 %v43_v4, %v42_v2  ;;  %v44_v14 = vld [vmem:[%s2213_s2 + $0x10] sm:$0xff]  ;;  %v1327_v16 = vpack.c.bf16 %v61_v13, %v60_v11  ;;  %v182_v63 = vunpack.c.0.s8 %v181_v48 }
   0x4   :  { %v1355_v8 = vpack.c.bf16 %v91_v6, %v90_v5  ;;  %v74_v9 = vld [vmem:[%s2213_s2 + $0x100] sm:$0xff]  ;;  %v75_v10 = vld [vmem:[%s2213_s2 + $0x108] sm:$0xff]  ;;  %1324 = vmatprep.subr.bf16.mxu0 %v1323_v3  ;;  %v45_v15 = vld [vmem:[%s2213_s2 + $0x18] sm:$0xff] }
   0x5   :  { %v1357_v12 = vpack.c.bf16 %v75_v10, %v74_v9  ;;  %1326 = vmatpush3.bf16.msra.mxu0 %v1325_v7  ;;  %v1329_v17 = vpack.c.bf16 %v45_v15, %v44_v14  ;;  %v92_v18 = vld [vmem:[%s2213_s2 + $0x190] sm:$0xff]  ;;  %v93_v19 = vld [vmem:[%s2213_s2 + $0x198] sm:$0xff]  ;;  %v62_v23 = vld [vmem:[%s2213_s2 + $0xa0] sm:$0xff]  ;;  %v1786_v13 = vsub.s32 %v182_v63, %v1759_v0 }
   0x6   :  { %1356 = vmatprep.subr.bf16.mxu1 %v1355_v8  ;;  %v76_v20 = vld [vmem:[%s2213_s2 + $0x110] sm:$0xff]  ;;  %v1359_v21 = vpack.c.bf16 %v93_v19, %v92_v18  ;;  %v77_v22 = vld [vmem:[%s2213_s2 + $0x118] sm:$0xff]  ;;  %v63_v24 = vld [vmem:[%s2213_s2 + $0xa8] sm:$0xff]  ;;  %1328 = vmatprep.subr.bf16.mxu0 %v1327_v16 }
   0x7   :  { %1358 = vmatpush3.bf16.msra.mxu1 %v1357_v12  ;;  %v1361_v25 = vpack.c.bf16 %v77_v22, %v76_v20  ;;  %v1331_v26 = vpack.c.bf16 %v63_v24, %v62_v23  ;;  %v46_v27 = vld [vmem:[%s2213_s2 + $0x20] sm:$0xff]  ;;  %v47_v28 = vld [vmem:[%s2213_s2 + $0x28] sm:$0xff]  ;;  %v64_v35 = vld [vmem:[%s2213_s2 + $0xb0] sm:$0xff] }
   0x8   :  { %v94_v29 = vld [vmem:[%s2213_s2 + $0x1a0] sm:$0xff]  ;;  %1360 = vmatprep.subr.bf16.mxu1 %v1359_v21  ;;  %v95_v30 = vld [vmem:[%s2213_s2 + $0x1a8] sm:$0xff]  ;;  %v1333_v33 = vpack.c.bf16 %v47_v28, %v46_v27  ;;  %v65_v36 = vld [vmem:[%s2213_s2 + $0xb8] sm:$0xff] }
   0x9   :  { %v78_v31 = vld [vmem:[%s2213_s2 + $0x120] sm:$0xff]  ;;  %v79_v32 = vld [vmem:[%s2213_s2 + $0x128] sm:$0xff]  ;;  %1330 = vmatpush3.bf16.msra.mxu0 %v1329_v17  ;;  %v1363_v34 = vpack.c.bf16 %v95_v30, %v94_v29  ;;  %v48_v37 = vld [vmem:[%s2213_s2 + $0x30] sm:$0xff]  ;;  %v1335_v39 = vpack.c.bf16 %v65_v36, %v64_v35 }
   0xa   :  { %1332 = vmatprep.subr.bf16.mxu0 %v1331_v26  ;;  %v1365_v38 = vpack.c.bf16 %v79_v32, %v78_v31  ;;  %v49_v40 = vld [vmem:[%s2213_s2 + $0x38] sm:$0xff]  ;;  %v96_v41 = vld [vmem:[%s2213_s2 + $0x1b0] sm:$0xff]  ;;  %v66_v46 = vld [vmem:[%s2213_s2 + $0xc0] sm:$0xff] }
   0xb   :  { %1362 = vmatpush3.bf16.msra.mxu1 %v1361_v25  ;;  %v97_v42 = vld [vmem:[%s2213_s2 + $0x1b8] sm:$0xff]  ;;  %v80_v44 = vld [vmem:[%s2213_s2 + $0x130] sm:$0xff]  ;;  %v67_v50 = vld [vmem:[%s2213_s2 + $0xc8] sm:$0xff]  ;;  %v1337_v51 = vpack.c.bf16 %v49_v40, %v48_v37 }
   0xc   :  { %1364 = vmatprep.subr.bf16.mxu1 %v1363_v34  ;;  %v1367_v43 = vpack.c.bf16 %v97_v42, %v96_v41  ;;  %v81_v45 = vld [vmem:[%s2213_s2 + $0x138] sm:$0xff]  ;;  %v98_v52 = vld [vmem:[%s2213_s2 + $0x1c0] sm:$0xff]  ;;  %v99_v53 = vld [vmem:[%s2213_s2 + $0x1c8] sm:$0xff]  ;;  %v1339_v55 = vpack.c.bf16 %v67_v50, %v66_v46 }
   0xd   :  { %1334 = vmatpush3.bf16.msra.mxu0 %v1333_v33  ;;  %v1369_v54 = vpack.c.bf16 %v81_v45, %v80_v44  ;;  %v50_v56 = vld [vmem:[%s2213_s2 + $0x40] sm:$0xff]  ;;  %v51_v57 = vld [vmem:[%s2213_s2 + $0x48] sm:$0xff]  ;;  %v1371_v59 = vpack.c.bf16 %v99_v53, %v98_v52  ;;  %v68_v61 = vld [vmem:[%s2213_s2 + $0xd0] sm:$0xff] }
   0xe   :  { %1336 = vmatprep.subr.bf16.mxu0 %v1335_v39  ;;  %v82_v58 = vld [vmem:[%s2213_s2 + $0x140] sm:$0xff]  ;;  %v83_v60 = vld [vmem:[%s2213_s2 + $0x148] sm:$0xff]  ;;  %v69_v62 = vld [vmem:[%s2213_s2 + $0xd8] sm:$0xff]  ;;  %v1341_v3 = vpack.c.bf16 %v51_v57, %v50_v56 }
   0xf   :  { %1366 = vmatpush3.bf16.msra.mxu1 %v1365_v38  ;;  %v100_v1 = vld [vmem:[%s2213_s2 + $0x1d0] sm:$0xff]  ;;  %v101_v2 = vld [vmem:[%s2213_s2 + $0x1d8] sm:$0xff]  ;;  %v1373_v4 = vpack.c.bf16 %v83_v60, %v82_v58  ;;  %v1343_v5 = vpack.c.bf16 %v69_v62, %v68_v61  ;;  %v70_v11 = vld [vmem:[%s2213_s2 + $0xe0] sm:$0xff] }
  0x10   :  { %1368 = vmatprep.subr.bf16.mxu1 %v1367_v43  ;;  %v52_v6 = vld [vmem:[%s2213_s2 + $0x50] sm:$0xff]  ;;  %v53_v7 = vld [vmem:[%s2213_s2 + $0x58] sm:$0xff]  ;;  %v1375_v9 = vpack.c.bf16 %v101_v2, %v100_v1  ;;  %v71_v12 = vld [vmem:[%s2213_s2 + $0xe8] sm:$0xff] }
  0x11   :  { %1338 = vmatpush3.bf16.msra.mxu0 %v1337_v51  ;;  %v84_v8 = vld [vmem:[%s2213_s2 + $0x150] sm:$0xff]  ;;  %v85_v10 = vld [vmem:[%s2213_s2 + $0x158] sm:$0xff]  ;;  %v102_v14 = vld [vmem:[%s2213_s2 + $0x1e0] sm:$0xff]  ;;  %v1345_v16 = vpack.c.bf16 %v53_v7, %v52_v6  ;;  %v1347_v19 = vpack.c.bf16 %v71_v12, %v70_v11 }
  0x12   :  { %1340 = vmatprep.subr.bf16.mxu0 %v1339_v55  ;;  %v103_v15 = vld [vmem:[%s2213_s2 + $0x1e8] sm:$0xff]  ;;  %v54_v17 = vld [vmem:[%s2213_s2 + $0x60] sm:$0xff]  ;;  %v1377_v18 = vpack.c.bf16 %v85_v10, %v84_v8  ;;  %v72_v25 = vld [vmem:[%s2213_s2 + $0xf0] sm:$0xff] }
  0x13   :  { %1370 = vmatpush3.bf16.msra.mxu1 %v1369_v54  ;;  %v55_v20 = vld [vmem:[%s2213_s2 + $0x68] sm:$0xff]  ;;  %v86_v21 = vld [vmem:[%s2213_s2 + $0x160] sm:$0xff]  ;;  %v1379_v23 = vpack.c.bf16 %v103_v15, %v102_v14  ;;  %v73_v26 = vld [vmem:[%s2213_s2 + $0xf8] sm:$0xff] }
  0x14   :  { %1372 = vmatprep.subr.bf16.mxu1 %v1371_v59  ;;  %v39_v22 = vld [vmem:[%s2211_s0] sm:$0xff]  ;;  %v87_v24 = vld [vmem:[%s2213_s2 + $0x168] sm:$0xff]  ;;  %v104_v29 = vld [vmem:[%s2213_s2 + $0x1f0] sm:$0xff]  ;;  %v1349_v31 = vpack.c.bf16 %v55_v20, %v54_v17  ;;  %v1351_v35 = vpack.c.bf16 %v73_v26, %v72_v25 }
  0x15   :  { %1342 = vmatpush3.bf16.msra.mxu0 %v1341_v3  ;;  %v186_v27 = vrot.slane %v39_v22, %v1786_v13  ;;  %v179_v28 = vcombine.high %v39_v22, %v39_v22  ;;  %v105_v30 = vld [vmem:[%s2213_s2 + $0x1f8] sm:$0xff]  ;;  %v1381_v34 = vpack.c.bf16 %v87_v24, %v86_v21  ;;  %v56_v36 = vld [vmem:[%s2213_s2 + $0x70] sm:$0xff]  ;;  %v122_v41 = vld [vmem:[%s2213_s2 + $0x280] sm:$0xff] }
  0x16   :  { %1344 = vmatprep.subr.bf16.mxu0 %v1343_v5  ;;  %v57_v37 = vld [vmem:[%s2213_s2 + $0x78] sm:$0xff]  ;;  %v88_v38 = vld [vmem:[%s2213_s2 + $0x170] sm:$0xff]  ;;  %v1383_v39 = vpack.c.bf16 %v105_v30, %v104_v29  ;;  %v123_v42 = vld [vmem:[%s2213_s2 + $0x288] sm:$0xff] }
  0x17   :  { %1374 = vmatpush3.bf16.msra.mxu1 %v1373_v4  ;;  %v194_v32 = vcombine.high %v186_v27, %v186_v27  ;;  %v193_v33 = vrot.slane %v179_v28, %v1786_v13  ;;  %v89_v40 = vld [vmem:[%s2213_s2 + $0x178] sm:$0xff]  ;;  %v154_v44 = vld [vmem:[%s2213_s2 + $0x380] sm:$0xff]  ;;  %v155_v45 = vld [vmem:[%s2213_s2 + $0x388] sm:$0xff]  ;;  %v1353_v46 = vpack.c.bf16 %v57_v37, %v56_v36  ;;  %v1387_v48 = vpack.c.bf16 %v123_v42, %v122_v41 }
  0x18   :  { %1376 = vmatprep.subr.bf16.mxu1 %v1375_v9  ;;  %v1385_v47 = vpack.c.bf16 %v89_v40, %v88_v38  ;;  %v106_v49 = vld [vmem:[%s2213_s2 + $0x200] sm:$0xff]  ;;  %v107_v50 = vld [vmem:[%s2213_s2 + $0x208] sm:$0xff]  ;;  %v1419_v52 = vpack.c.bf16 %v155_v45, %v154_v44  ;;  %v124_v54 = vld [vmem:[%s2213_s2 + $0x290] sm:$0xff] }
  0x19   :  { %1346 = vmatpush3.bf16.msra.mxu0 %v1345_v16  ;;  %285 = vmatprep.mubr.f32.mxu0 %v194_v32  ;;  %v195_v43 = vcombine.high %v193_v33, %v193_v33  ;;  %v138_v51 = vld [vmem:[%s2213_s2 + $0x300] sm:$0xff]  ;;  %v139_v53 = vld [vmem:[%s2213_s2 + $0x308] sm:$0xff]  ;;  %v125_v55 = vld [vmem:[%s2213_s2 + $0x298] sm:$0xff]  ;;  %v1389_v58 = vpack.c.bf16 %v107_v50, %v106_v49 }
  0x1a   :  { %1348 = vmatprep.subr.bf16.mxu0 %v1347_v19  ;;  %v156_v56 = vld [vmem:[%s2213_s2 + $0x390] sm:$0xff]  ;;  %v157_v57 = vld [vmem:[%s2213_s2 + $0x398] sm:$0xff]  ;;  %v1421_v59 = vpack.c.bf16 %v139_v53, %v138_v51  ;;  %v1391_v60 = vpack.c.bf16 %v125_v55, %v124_v54  ;;  %v126_v3 = vld [vmem:[%s2213_s2 + $0x2a0] sm:$0xff] }
  0x1b   :  { %1378 = vmatpush3.bf16.msra.mxu1 %v1377_v18  ;;  %355 = vmatprep.mubr.f32.mxu1 %v195_v43  ;;  %v108_v61 = vld [vmem:[%s2213_s2 + $0x210] sm:$0xff]  ;;  %v109_v62 = vld [vmem:[%s2213_s2 + $0x218] sm:$0xff]  ;;  %v1423_v1 = vpack.c.bf16 %v157_v57, %v156_v56  ;;  %v127_v4 = vld [vmem:[%s2213_s2 + $0x2a8] sm:$0xff] }
  0x1c   :  { %1380 = vmatprep.subr.bf16.mxu1 %v1379_v23  ;;  %v140_v63 = vld [vmem:[%s2213_s2 + $0x310] sm:$0xff]  ;;  %v141_v2 = vld [vmem:[%s2213_s2 + $0x318] sm:$0xff]  ;;  %v158_v5 = vld [vmem:[%s2213_s2 + $0x3a0] sm:$0xff]  ;;  %v1393_v7 = vpack.c.bf16 %v109_v62, %v108_v61  ;;  %v1395_v9 = vpack.c.bf16 %v127_v4, %v126_v3 }
  0x1d   :  { %1350 = vmatpush3.bf16.msra.mxu0 %v1349_v31  ;;  %v159_v6 = vld [vmem:[%s2213_s2 + $0x3a8] sm:$0xff]  ;;  %v1425_v8 = vpack.c.bf16 %v141_v2, %v140_v63  ;;  %v110_v10 = vld [vmem:[%s2213_s2 + $0x220] sm:$0xff]  ;;  %v128_v16 = vld [vmem:[%s2213_s2 + $0x2b0] sm:$0xff] }
  0x1e   :  { %1352 = vmatprep.subr.bf16.mxu0 %v1351_v35  ;;  %v111_v11 = vld [vmem:[%s2213_s2 + $0x228] sm:$0xff]  ;;  %v142_v12 = vld [vmem:[%s2213_s2 + $0x320] sm:$0xff]  ;;  %v1427_v14 = vpack.c.bf16 %v159_v6, %v158_v5  ;;  %v129_v17 = vld [vmem:[%s2213_s2 + $0x2b8] sm:$0xff] }
  0x1f   :  { %1382 = vmatpush3.bf16.msra.mxu1 %v1381_v34  ;;  %v143_v15 = vld [vmem:[%s2213_s2 + $0x328] sm:$0xff]  ;;  %v160_v18 = vld [vmem:[%s2213_s2 + $0x3b0] sm:$0xff]  ;;  %v161_v19 = vld [vmem:[%s2213_s2 + $0x3b8] sm:$0xff]  ;;  %v1397_v20 = vpack.c.bf16 %v111_v11, %v110_v10  ;;  %v1399_v23 = vpack.c.bf16 %v129_v17, %v128_v16 }
  0x20   :  { %1384 = vmatprep.subr.bf16.mxu1 %v1383_v39  ;;  %v112_v21 = vld [vmem:[%s2213_s2 + $0x230] sm:$0xff]  ;;  %v1429_v22 = vpack.c.bf16 %v143_v15, %v142_v12  ;;  %v113_v24 = vld [vmem:[%s2213_s2 + $0x238] sm:$0xff]  ;;  %v130_v28 = vld [vmem:[%s2213_s2 + $0x2c0] sm:$0xff] }
  0x21   :  { %1354 = vmatpush3.bf16.msra.mxu0 %v1353_v46  ;;  %v144_v25 = vld [vmem:[%s2213_s2 + $0x330] sm:$0xff]  ;;  %v145_v26 = vld [vmem:[%s2213_s2 + $0x338] sm:$0xff]  ;;  %v131_v29 = vld [vmem:[%s2213_s2 + $0x2c8] sm:$0xff] }
  0x22   :  { %1388 = vmatprep.subr.bf16.mxu0 %v1387_v48  ;;  %v162_v30 = vld [vmem:[%s2213_s2 + $0x3c0] sm:$0xff]  ;;  %v163_v31 = vld [vmem:[%s2213_s2 + $0x3c8] sm:$0xff] }
  0x23   :  { %1386 = vmatpush3.bf16.msra.mxu1 %v1385_v47  ;;  %v40_v32 = vld [vmem:[%s2211_s0 + $0x8] sm:$0xff] }
  0x24   :  { %1420 = vmatprep.subr.bf16.mxu1 %v1419_v52  ;;  %286 = vmatmul.mubr.f32.vlgmr.msra.gmra.mrb[0].mxu0 %v186_v27  ;;  %v1431_v27 = vpack.c.bf16 %v161_v19, %v160_v18 }
  0x25   :  { %1390 = vmatpush3.bf16.msra.mxu0 %v1389_v58 }
  0x26   :  { %356 = vmatmul.mubr.f32.vlgmr.msra.gmra.mrb[0].mxu1 %v193_v33  ;;  %1392 = vmatprep.subr.bf16.mxu0 %v1391_v60 }
  0x27   :  { %1422 = vmatpush3.bf16.msra.mxu1 %v1421_v59 }
  0x28   :  { %1424 = vmatprep.subr.bf16.mxu1 %v1423_v1 }
  0x29   :  { %1394 = vmatpush3.bf16.msra.mxu0 %v1393_v7 }
  0x2a   :  { %1396 = vmatprep.subr.bf16.mxu0 %v1395_v9 }
  0x2b   :  { %1426 = vmatpush3.bf16.msra.mxu1 %v1425_v8 }
  0x2c   :  { %1428 = vmatprep.subr.bf16.mxu1 %v1427_v14 }
  0x2d   :  { %18 = vsyncpa [#allocation5], 0  ;;  %1398 = vmatpush3.bf16.msra.mxu0 %v1397_v20  ;;  %v1401_v33 = vpack.c.bf16 %v113_v24, %v112_v21  ;;  %v1947_v34 = vrot.slane %v40_v32, %v1786_v13  ;;  %v196_v35 = vcombine.high %v40_v32, %v40_v32  ;;  %v1433_v36 = vpack.c.bf16 %v145_v26, %v144_v25  ;;  %v114_v38 = vld [vmem:[%s2213_s2 + $0x240] sm:$0xff]  ;;  %v115_v39 = vld [vmem:[%s2213_s2 + $0x248] sm:$0xff]  ;;  %s1569_s16 = smov 8   ;;  %s1570_s30 = smov 120  }
  0x2e   :  { %1400 = vmatprep.subr.bf16.mxu0 %v1399_v23  ;;  %v1403_v37 = vpack.c.bf16 %v131_v29, %v130_v28  ;;  %v146_v40 = vld [vmem:[%s2213_s2 + $0x340] sm:$0xff]  ;;  %v1435_v41 = vpack.c.bf16 %v163_v31, %v162_v30  ;;  %v147_v42 = vld [vmem:[%s2213_s2 + $0x348] sm:$0xff]  ;;  %v132_v43 = vld [vmem:[%s2213_s2 + $0x2d0] sm:$0xff]  ;;  %v1405_v49 = vpack.c.bf16 %v115_v39, %v114_v38  ;;  %v1566_v25 = vmov 0.0|0.0  }
  0x2f   :  { %1430 = vmatpush3.bf16.msra.mxu1 %v1429_v22  ;;  %v133_v44 = vld [vmem:[%s2213_s2 + $0x2d8] sm:$0xff]  ;;  %v211_v45 = vcombine.high %v1947_v34, %v1947_v34  ;;  %v210_v46 = vrot.slane %v196_v35, %v1786_v13  ;;  %v164_v47 = vld [vmem:[%s2213_s2 + $0x3d0] sm:$0xff]  ;;  %v1437_v51 = vpack.c.bf16 %v147_v42, %v146_v40  ;;  %v134_v58 = vld [vmem:[%s2213_s2 + $0x2e0] sm:$0xff]  ;;  %vm1567_vm0 = vmmov 0  }
  0x30   :  { %1432 = vmatprep.subr.bf16.mxu1 %v1431_v27  ;;  %v165_v48 = vld [vmem:[%s2213_s2 + $0x3d8] sm:$0xff]  ;;  %v1407_v52 = vpack.c.bf16 %v133_v44, %v132_v43  ;;  %v116_v53 = vld [vmem:[%s2213_s2 + $0x250] sm:$0xff]  ;;  %v135_v59 = vld [vmem:[%s2213_s2 + $0x2e8] sm:$0xff]  ;;  %v1568_v29 = vmov 0.0   ;;  %vm513_vm1 = vcmask 261120   ;;  %vm608_vm2 = vcmask 64512  }
  0x31   :  { %1402 = vmatpush3.bf16.msra.mxu0 %v1401_v33  ;;  %425 = vmatprep.mubr.f32.mxu0 %v211_v45  ;;  %v212_v50 = vcombine.high %v210_v46, %v210_v46  ;;  %v117_v54 = vld [vmem:[%s2213_s2 + $0x258] sm:$0xff]  ;;  %v148_v55 = vld [vmem:[%s2213_s2 + $0x350] sm:$0xff]  ;;  %v1439_v56 = vpack.c.bf16 %v165_v48, %v164_v47  ;;  %v166_v60 = vld [vmem:[%s2213_s2 + $0x3e0] sm:$0xff]  ;;  %v1411_v1 = vpack.c.bf16 %v135_v59, %v134_v58 }
  0x32   :  { %1404 = vmatprep.subr.bf16.mxu0 %v1403_v37  ;;  %v149_v57 = vld [vmem:[%s2213_s2 + $0x358] sm:$0xff]  ;;  %v167_v61 = vld [vmem:[%s2213_s2 + $0x3e8] sm:$0xff]  ;;  %v1409_v62 = vpack.c.bf16 %v117_v54, %v116_v53  ;;  %v118_v2 = vld [vmem:[%s2213_s2 + $0x260] sm:$0xff] }
  0x33   :  { %1434 = vmatpush3.bf16.msra.mxu1 %v1433_v36  ;;  %495 = vmatprep.mubr.f32.mxu1 %v212_v50  ;;  %v1441_v63 = vpack.c.bf16 %v149_v57, %v148_v55  ;;  %v119_v3 = vld [vmem:[%s2213_s2 + $0x268] sm:$0xff]  ;;  %v150_v4 = vld [vmem:[%s2213_s2 + $0x360] sm:$0xff]  ;;  %v1443_v5 = vpack.c.bf16 %v167_v61, %v166_v60  ;;  %v136_v7 = vld [vmem:[%s2213_s2 + $0x2f0] sm:$0xff] }
  0x34   :  { %1436 = vmatprep.subr.bf16.mxu1 %v1435_v41  ;;  %v151_v6 = vld [vmem:[%s2213_s2 + $0x368] sm:$0xff]  ;;  %v137_v8 = vld [vmem:[%s2213_s2 + $0x2f8] sm:$0xff]  ;;  %v168_v9 = vld [vmem:[%s2213_s2 + $0x3f0] sm:$0xff]  ;;  %v1413_v11 = vpack.c.bf16 %v119_v3, %v118_v2 }
  0x35   :  { %1406 = vmatpush3.bf16.msra.mxu0 %v1405_v49  ;;  %v169_v10 = vld [vmem:[%s2213_s2 + $0x3f8] sm:$0xff]  ;;  %v1445_v12 = vpack.c.bf16 %v151_v6, %v150_v4  ;;  %v1415_v14 = vpack.c.bf16 %v137_v8, %v136_v7  ;;  %v120_v15 = vld [vmem:[%s2213_s2 + $0x270] sm:$0xff]  ;;  %v502_v22 = vld [vmem:[%s2215_s4] sm:$0xff] }
  0x36   :  { %1408 = vmatprep.subr.bf16.mxu0 %v1407_v52  ;;  %v121_v16 = vld [vmem:[%s2213_s2 + $0x278] sm:$0xff]  ;;  %v1447_v17 = vpack.c.bf16 %v169_v10, %v168_v9  ;;  %v152_v18 = vld [vmem:[%s2213_s2 + $0x370] sm:$0xff]  ;;  %v503_v23 = vld [vmem:[%s2215_s4 + $0x8] sm:$0xff] }
  0x37   :  { %1438 = vmatpush3.bf16.msra.mxu1 %v1437_v51  ;;  %v153_v19 = vld [vmem:[%s2213_s2 + $0x378] sm:$0xff]  ;;  %v1417_v20 = vpack.c.bf16 %v121_v16, %v120_v15  ;;  %v1452_v24 = vpack.c.bf16 %v503_v23, %v502_v22  ;;  %v504_v26 = vld [vmem:[%s2215_s4 + $0x10] sm:$0xff]  ;;  %v41_v30 = vld [vmem:[%s2212_s1] sm:$0x3] }
  0x38   :  { %1440 = vmatprep.subr.bf16.mxu1 %v1439_v56  ;;  %v1449_v21 = vpack.c.bf16 %v153_v19, %v152_v18  ;;  %v505_v27 = vld [vmem:[%s2215_s4 + $0x18] sm:$0xff]  ;;  %591 = vrot.lane.b32.xlu0 %v41_v30, %s1569_s16  ;;  %v1151_v32 = vld [vmem:[%s2214_s3] ss:$0 sm:$0xff]  ;;  %v684_v56 = vld [vmem:[%s2219_s8 + $0x8] sm:$0xff] }
  0x39   :  { %1410 = vmatpush3.bf16.msra.mxu0 %v1409_v62  ;;  %v1455_v28 = vpack.c.bf16 %v505_v27, %v504_v26  ;;  %v600_v49 = vld [vmem:[%s2217_s6] sm:$0xff]  ;;  %v692_v57 = vld [vmem:[%s2219_s8 + $0x48] sm:$0xff]  ;;  %v686_v58 = vld [vmem:[%s2219_s8 + $0x18] sm:$0xff] }
  0x3a   :  { %1412 = vmatprep.subr.bf16.mxu0 %v1411_v1  ;;  %v1152_v50 = vld [vmem:[%s2216_s5] ss:$0 sm:$0xff]  ;;  %v1457_v59 = vpack.c.bf16 %v692_v57, %v684_v56  ;;  %v694_v60 = vld [vmem:[%s2219_s8 + $0x58] sm:$0xff]  ;;  %v685_v62 = vld [vmem:[%s2219_s8 + $0x10] sm:$0xff] }
  0x3b   :  { %1442 = vmatpush3.bf16.msra.mxu1 %v1441_v63  ;;  %v1465_v61 = vpack.c.bf16 %v694_v60, %v686_v58  ;;  %v693_v63 = vld [vmem:[%s2219_s8 + $0x50] sm:$0xff]  ;;  %v691_v6 = vld [vmem:[%s2219_s8 + $0x40] sm:$0xff]  ;;  %v700_v10 = vld [vmem:[%s2219_s8 + $0x88] sm:$0xff] }
  0x3c   :  { %1444 = vmatprep.subr.bf16.mxu1 %v1443_v5  ;;  %v1467_v1 = vpack.c.bf16 %v693_v63, %v685_v62  ;;  %v683_v5 = vld [vmem:[%s2219_s8] sm:$0xff]  ;;  %v710_v15 = vld [vmem:[%s2219_s8 + $0xd8] sm:$0xff]  ;;  %v688_v23 = vld [vmem:[%s2219_s8 + $0x28] sm:$0xff] }
  0x3d   :  { %1414 = vmatpush3.bf16.msra.mxu0 %v1413_v11  ;;  %v1459_v8 = vpack.c.bf16 %v691_v6, %v683_v5  ;;  %v708_v11 = vld [vmem:[%s2219_s8 + $0xc8] sm:$0xff]  ;;  %v699_v16 = vld [vmem:[%s2219_s8 + $0x80] sm:$0xff]  ;;  %v698_v27 = vld [vmem:[%s2219_s8 + $0x78] sm:$0xff] }
  0x3e   :  { %1416 = vmatprep.subr.bf16.mxu0 %v1415_v14  ;;  %v1461_v14 = vpack.c.bf16 %v708_v11, %v700_v10  ;;  %v1154_v30 = vld [vmem:[%s2218_s7] ss:$0 sm:$0xff] }
  0x3f   :  { %1446 = vmatpush3.bf16.msra.mxu1 %v1445_v12  ;;  %v702_v12 = vld [vmem:[%s2219_s8 + $0x98] sm:$0xff] }
  0x40   :  { %1448 = vmatprep.subr.bf16.mxu1 %v1447_v17  ;;  %v707_v17 = vld [vmem:[%s2219_s8 + $0xc0] sm:$0xff]  ;;  %v1469_v18 = vpack.c.bf16 %v710_v15, %v702_v12 }
  0x41   :  { %1418 = vmatpush3.bf16.msra.mxu0 %v1417_v20  ;;  %v1463_v19 = vpack.c.bf16 %v707_v17, %v699_v16  ;;  %v701_v20 = vld [vmem:[%s2219_s8 + $0x90] sm:$0xff] }
  0x42   :  { %1451 = vmatprep.subr.bf16.mxu0 %v1566_v25 }
  0x43   :  { %1450 = vmatpush3.bf16.msra.mxu1 %v1449_v21  ;;  %v709_v21 = vld [vmem:[%s2219_s8 + $0xd0] sm:$0xff] }
  0x44   :  { %426 = vmatmul.mubr.f32.vlgmr.msra.gmra.mrb[2].mxu0 %v1947_v34  ;;  %1318 = vmatprep.subr.mxu1 %v1568_v29  ;;  %v1471_v22 = vpack.c.bf16 %v709_v21, %v701_v20 }
  0x45   :  { %1453 = vmatpush3.bf16.msra.mxu0 %v1452_v24  ;;  %1315 = vmatprep.mubr.msk.f32.mxu0 %vm1567_vm0, %v1568_v29  ;;  %v696_v24 = vld [vmem:[%s2219_s8 + $0x68] sm:$0xff] }
  0x46   :  { %496 = vmatmul.mubr.f32.vlgmr.msra.gmra.mrb[2].mxu1 %v210_v46  ;;  %1454 = vmatprep.subr.bf16.mxu0 %v1566_v25  ;;  %v690_v25 = vld [vmem:[%s2219_s8 + $0x38] sm:$0xff]  ;;  %v1473_v26 = vpack.c.bf16 %v696_v24, %v688_v23 }
  0x47   :  { %1320 = vmatprep.mubr.msk.f32.mxu1 %vm1567_vm0, %v1568_v29  ;;  %1319 = vmatpush3.msra.mxu1 %v600_v49  ;;  %v705_v49 = vld [vmem:[%s2219_s8 + $0xb0] sm:$0xff] }
  0x48   :  { %1458 = vmatprep.subr.bf16.mxu1 %v1457_v59 }
  0x49   :  { %1456 = vmatpush3.bf16.msra.mxu0 %v1455_v28  ;;  %v1481_v28 = vpack.c.bf16 %v698_v27, %v690_v25 }
  0x4a   :  { %1466 = vmatprep.subr.bf16.mxu0 %v1465_v61 }
  0xaa   :  { %v592_v2 = vpop.permute.xlu0 %591 }
  0xf7   :  { %v1192_v31 = vpop.f32.mrb[0].mxu0 }
  0xf8   :  { %v1193_v33 = vpop.f32.mrb[1].mxu0 }
  0xf9   :  { %v1227_v34 = vpop.f32.mrb[0].mxu1  ;;  %v1194_v35 = vadd.f32 %v1193_v33, %v1192_v31  ;;  %v687_v31 = vld [vmem:[%s2219_s8 + $0x20] sm:$0xff]  ;;  %v689_v33 = vld [vmem:[%s2219_s8 + $0x30] sm:$0xff] }
  0xfa   :  { %v1228_v36 = vpop.f32.mrb[1].mxu1 }
  0xfb   :  { %v1229_v37 = vadd.f32 %v1228_v36, %v1227_v34  ;;  %v288_v38 = vadd.f32 %v1194_v35, %v1151_v32  ;;  %v695_v32 = vld [vmem:[%s2219_s8 + $0x60] sm:$0xff]  ;;  %v697_v34 = vld [vmem:[%s2219_s8 + $0x70] sm:$0xff]  ;;  %v704_v35 = vld [vmem:[%s2219_s8 + $0xa8] sm:$0xff] }
  0xfd   :  { %v358_v39 = vadd.f32 %v1229_v37, %v288_v38  ;;  %v712_v37 = vld [vmem:[%s2219_s8 + $0xe8] sm:$0xff]  ;;  %v706_v38 = vld [vmem:[%s2219_s8 + $0xb8] sm:$0xff] }
 0x117   :  { %v1262_v40 = vpop.f32.mrb[2].mxu0 }
 0x118   :  { %v1263_v41 = vpop.f32.mrb[3].mxu0 }
 0x119   :  { %v1297_v42 = vpop.f32.mrb[2].mxu1  ;;  %v1264_v43 = vadd.f32 %v1263_v41, %v1262_v40 }
 0x11a   :  { %v1298_v44 = vpop.f32.mrb[3].mxu1 }
 0x11b   :  { %v1299_v45 = vadd.f32 %v1298_v44, %v1297_v42  ;;  %v428_v46 = vadd.f32 %v1264_v43, %v358_v39  ;;  %v714_v39 = vld [vmem:[%s2219_s8 + $0xf8] sm:$0xff]  ;;  %v1475_v42 = vpack.c.bf16 %v695_v32, %v687_v31  ;;  %v1483_v43 = vpack.c.bf16 %v697_v34, %v689_v33  ;;  %v703_v44 = vld [vmem:[%s2219_s8 + $0xa0] sm:$0xff] }
 0x11d   :  { %v498_v47 = vadd.f32 %v1299_v45, %v428_v46  ;;  %v1477_v46 = vpack.c.bf16 %v712_v37, %v704_v35 }
 0x11f   :  { %v501_v48 = vmax.f32 %v498_v47, 0.0  ;;  %v1485_v47 = vpack.c.bf16 %v714_v39, %v706_v38 }
 0x121   :  { %1316 = vmatmul.mubr.msk.f32.vlgmr.msra.gmra.mrb[4].mxu0 %vm513_vm1, %v501_v48  ;;  %v711_v48 = vld [vmem:[%s2219_s8 + $0xe0] sm:$0xff] }
 0x122   :  { %895 = vmatprep.mubr.f32.mxu0 %v1568_v29  ;;  %1468 = vmatpush1.bf16.msra.mxu0 %v1467_v1 }
 0x123   :  { %1470 = vmatprep.subr.bf16.mxu0 %v1469_v18 }
 0x126   :  { %1472 = vmatpush1.bf16.msra.mxu0 %v1471_v22 }
 0x127   :  { %1482 = vmatprep.subr.bf16.mxu0 %v1481_v28 }
 0x1f4   :  { %v583_v51 = vpop.f32.mrb[4].mxu0 }
 0x1f5   :  { %v584_v52 = vadd.f32 %v1152_v50, %v583_v51  ;;  %v1317_v53 = vpop.f32.mrb[5].mxu0  ;;  %v713_v50 = vld [vmem:[%s2219_s8 + $0xf0] sm:$0xff]  ;;  %v1479_v51 = vpack.c.bf16 %v711_v48, %v703_v44  ;;  %s1571_s8 = smov [#allocation4]  }
 0x1f6   :  { %s1139_s12 = sshll.u32 %s1571_s8, 4  ;;  %s1140_s12 = int_to_ptr.vmem [resolvable:$true] %s1139_s12 }
 0x1f7   :  { %v587_v54 = vmul.f32 0.5, %v584_v52  ;;  %1122 = vst [vmem:[#allocation4] sm:$0x3] %v584_v52  ;;  %s1517_s13 = scalar_lea.vmem %s1140_s12, 32  ;;  %p1522_p1 = scmp.lt.s32.totalorder %s1140_s12, %s1140_s12 }
 0x1f8   :  { %p1518_p0 = scmp.ne.s32.totalorder %s1140_s12, %s1517_s13  ;;  %p1523_p2 = scmp.lt.s32.totalorder %s1517_s13, %s1517_s13 }
 0x1f9   :  { %v588_v55 = vmul.f32 1.442695, %v587_v54 }
 0x1fa   :  { %p1524_p3 = por %p1523_p2, %p1522_p1 }
 0x1fb   :  { %1499 = vpow2.f32 %v588_v55 }
 0x1fc   :  { %p1525_p4 = pnand %p1524_p3, %p1518_p0 }
 0x205   :  { %v1500_v3 = vpop.eup %1499 }
 0x206   :  { %v594_v4 = vmul.f32 %v1500_v3, %v592_v2 }
 0x208   :  { %596 = vrot.lane.b32.xlu0 %v594_v4, %s1570_s30 }
 0x27a   :  { %v597_v7 = vpop.permute.xlu0 %596 }
 0x27b   :  { %v599_v9 = vadd.f32 %v597_v7, %v584_v52  ;;  %v1487_v52 = vpack.c.bf16 %v713_v50, %v705_v49 }
 0x27d   :  { %1321 = vmatmul.mubr.msk.f32.vlgmr.msra.gmra.mrb[4].mxu1 %vm608_vm2, %v599_v9 }
 0x27e   :  { %1460 = vmatpush1.bf16.msra.mxu1 %v1459_v8  ;;  %824 = vmatprep.mubr.f32.mxu1 %v1568_v29 }
 0x27f   :  { %1462 = vmatprep.subr.bf16.mxu1 %v1461_v14 }
 0x282   :  { %1464 = vmatpush1.bf16.msra.mxu1 %v1463_v19 }
 0x283   :  { %1474 = vmatprep.subr.bf16.mxu1 %v1473_v26 }
 0x350   :  { %v678_v36 = vpop.f32.mrb[4].mxu1 }
 0x351   :  { %v679_v40 = vadd.f32 %v1154_v30, %v678_v36  ;;  %v1322_v41 = vpop.f32.mrb[5].mxu1 }
 0x353   :  { %v682_v45 = vmax.f32 %v679_v40, 0.0 }
 0x355   :  { %1156 = vmatmul.mubr.msk.f32.vlgmr.msra.gmra.mrb[6].mxu1 %vm513_vm1, %v682_v45  ;;  %1157 = vmatmul.mubr.msk.f32.vlgmr.msra.gmra.mrb[6].mxu0 %vm513_vm1, %v682_v45 }
 0x356   :  { %1476 = vmatpush1.bf16.msra.mxu1 %v1475_v42  ;;  %1484 = vmatpush1.bf16.msra.mxu0 %v1483_v43 }
 0x357   :  { %1478 = vmatprep.subr.bf16.mxu1 %v1477_v46  ;;  %1486 = vmatprep.subr.bf16.mxu0 %v1485_v47 }
 0x358   :  { %966 = vmatprep.mubr.f32.mxu1 %v1568_v29  ;;  %1037 = vmatprep.mubr.f32.mxu0 %v1568_v29 }
 0x35a   :  { %1480 = vmatpush1.bf16.msra.mxu1 %v1479_v51  ;;  %1488 = vmatpush1.bf16.msra.mxu0 %v1487_v52 }
 0x35d   :  { %1158 = vmatmul.mubr.msk.f32.vlgmr.msra.gmra.mrb[8].mxu1 %vm513_vm1, %v682_v45  ;;  %1159 = vmatmul.mubr.msk.f32.vlgmr.msra.gmra.mrb[8].mxu0 %vm513_vm1, %v682_v45 }
 0x35e   :  { %1528 = shalt.err (!%p1525_p4)
}
 0x35f   :  { %s1529_s0 = scalar_lea.hbm %s2222_s11, 32 }
 0x360   :  { %p1530_p5 = scmp.ne.s32.totalorder %s2222_s11, %s1529_s0  ;;  %p1533_p6 = scmp.lt.u32.totalorder %s1529_s0, %s2222_s11 }
 0x362   :  { %p1535_p7 = pnand %p1533_p6, %p1530_p5 }
 0x364   :  { %1538 = shalt.err (!%p1535_p7)
}
 0x365   :  { %1142 = dma.vmem_to_hbm [thread:$0]  %s1140_s12, 32, %s2222_s11, [#allocation5]   ;;  %v719_v29 = vsub.s32 0, %v1759_v0  ;;  %v727_v53 = vsub.s32 2, %v1759_v0  ;;  %v715_v54 = vld [vmem:[%s2220_s9] sm:$0xff]  ;;  %v723_v55 = vsub.s32 1, %v1759_v0 }
 0x366   :  { %v731_v56 = vsub.s32 3, %v1759_v0  ;;  %v735_v4 = vsub.s32 4, %v1759_v0  ;;  %v743_v5 = vsub.s32 6, %v1759_v0  ;;  %v739_v8 = vsub.s32 5, %v1759_v0  ;;  %s1572_s9 = smov [#allocation2]  }
 0x367   :  { %v720_v57 = vrot.slane %v715_v54, %v719_v29  ;;  %v728_v58 = vrot.slane %v715_v54, %v727_v53  ;;  %v724_v59 = vrot.slane %v715_v54, %v723_v55  ;;  %v747_v9 = vsub.s32 7, %v1759_v0  ;;  %s1129_s11 = sshll.u32 %s1572_s9, 4  ;;  %s1130_s11 = int_to_ptr.vmem [resolvable:$true] %s1129_s11 }
 0x368   :  { %v732_v60 = vrot.slane %v715_v54, %v731_v56  ;;  %v736_v15 = vrot.slane %v715_v54, %v735_v4  ;;  %v744_v16 = vrot.slane %v715_v54, %v743_v5  ;;  %v740_v17 = vrot.slane %v715_v54, %v739_v8  ;;  %s1539_s7 = scalar_lea.vmem %s1130_s11, 256  ;;  %p1544_p9 = scmp.lt.s32.totalorder %s1130_s11, %s1130_s11 }
 0x369   :  { %v748_v18 = vrot.slane %v715_v54, %v747_v9  ;;  %p1540_p8 = scmp.ne.s32.totalorder %s1130_s11, %s1539_s7  ;;  %p1545_p10 = scmp.lt.s32.totalorder %s1539_s7, %s1539_s7 }
 0x36b   :  { %p1546_p11 = por %p1545_p10, %p1544_p9 }
 0x36d   :  { %p1547_p12 = pnand %p1546_p11, %p1540_p8 }
 0x428   :  { %v826_v61 = vpop.f32.mrb[6].mxu1  ;;  %v897_v62 = vpop.f32.mrb[6].mxu0 }
 0x429   :  { %v827_v63 = vadd.f32 %v826_v61, %v720_v57  ;;  %v898_v1 = vadd.f32 %v897_v62, %v728_v58  ;;  %v828_v2 = vpop.f32.mrb[7].mxu1  ;;  %v899_v3 = vpop.f32.mrb[7].mxu0 }
 0x42a   :  { %v829_v6 = vadd.f32 %v828_v2, %v724_v59  ;;  %v900_v7 = vadd.f32 %v899_v3, %v732_v60 }
 0x42b   :  { %v1044_v10 = vmul.f32 0.5, %v827_v63  ;;  %v1046_v11 = vmul.f32 0.5, %v898_v1 }
 0x42c   :  { %v1045_v12 = vmul.f32 0.5, %v829_v6  ;;  %v1047_v14 = vmul.f32 0.5, %v900_v7 }
 0x42d   :  { %1501 = vtanh.f32 %v1044_v10 }
 0x42e   :  { %1503 = vtanh.f32 %v1046_v11 }
 0x42f   :  { %1505 = vtanh.f32 %v1045_v12 }
 0x430   :  { %1507 = vtanh.f32 %v1047_v14  ;;  %v968_v19 = vpop.f32.mrb[8].mxu1  ;;  %v1039_v20 = vpop.f32.mrb[8].mxu0 }
 0x431   :  { %v969_v21 = vadd.f32 %v968_v19, %v736_v15  ;;  %v1040_v22 = vadd.f32 %v1039_v20, %v744_v16  ;;  %v970_v23 = vpop.f32.mrb[9].mxu1  ;;  %v1041_v24 = vpop.f32.mrb[9].mxu0 }
 0x432   :  { %v971_v25 = vadd.f32 %v970_v23, %v740_v17  ;;  %v1042_v0 = vadd.f32 %v1041_v24, %v748_v18 }
 0x433   :  { %v1048_v26 = vmul.f32 0.5, %v969_v21  ;;  %v1050_v27 = vmul.f32 0.5, %v1040_v22 }
 0x434   :  { %v1049_v28 = vmul.f32 0.5, %v971_v25  ;;  %v1051_v30 = vmul.f32 0.5, %v1042_v0 }
 0x435   :  { %1509 = vtanh.f32 %v1048_v26 }
 0x436   :  { %1511 = vtanh.f32 %v1050_v27 }
 0x437   :  { %v1502_v31 = vpop.eup %1501  ;;  %1513 = vtanh.f32 %v1049_v28 }
 0x438   :  { %v1504_v32 = vpop.eup %1503  ;;  %v1060_v33 = vmul.f32 0.5, %v1502_v31  ;;  %1515 = vtanh.f32 %v1051_v30 }
 0x439   :  { %v1506_v34 = vpop.eup %1505  ;;  %v1062_v35 = vmul.f32 0.5, %v1504_v32 }
 0x43a   :  { %v1508_v36 = vpop.eup %1507  ;;  %v1068_v37 = vadd.f32 0.5, %v1060_v33  ;;  %v1061_v38 = vmul.f32 0.5, %v1506_v34 }
 0x43b   :  { %v1070_v39 = vadd.f32 0.5, %v1062_v35  ;;  %v1063_v40 = vmul.f32 0.5, %v1508_v36 }
 0x43c   :  { %v1069_v41 = vadd.f32 0.5, %v1061_v38 }
 0x43d   :  { %v1071_v42 = vadd.f32 0.5, %v1063_v40 }
 0x43e   :  { %v1084_v43 = vcombine.low %v1068_v37, %v1069_v41 }
 0x43f   :  { %v1510_v44 = vpop.eup %1509  ;;  %v1085_v45 = vcombine.low %v1070_v39, %v1071_v42 }
 0x440   :  { %v1512_v46 = vpop.eup %1511  ;;  %v1064_v47 = vmul.f32 0.5, %v1510_v44  ;;  %v1092_v48 = vrot.slane %v1084_v43, %v1786_v13 }
 0x441   :  { %v1514_v49 = vpop.eup %1513  ;;  %v1066_v50 = vmul.f32 0.5, %v1512_v46  ;;  %v1099_v51 = vrot.slane %v1085_v45, %v1786_v13 }
 0x442   :  { %v1516_v52 = vpop.eup %1515  ;;  %v1072_v29 = vadd.f32 0.5, %v1064_v47  ;;  %v1065_v53 = vmul.f32 0.5, %v1514_v49 }
 0x443   :  { %v1074_v54 = vadd.f32 0.5, %v1066_v50  ;;  %v1067_v55 = vmul.f32 0.5, %v1516_v52  ;;  %v1100_v56 = vcombine.low %v1092_v48, %v1099_v51 }
 0x444   :  { %v1073_v57 = vadd.f32 0.5, %v1065_v53 }
 0x445   :  { %v1075_v58 = vadd.f32 0.5, %v1067_v55  ;;  %1120 = vst [vmem:[#allocation2] sm:$0xff] %v1100_v56 }
 0x446   :  { %v1101_v59 = vcombine.low %v1072_v29, %v1073_v57 }
 0x447   :  { %v1102_v60 = vcombine.low %v1074_v54, %v1075_v58 }
 0x448   :  { %v1109_v61 = vrot.slane %v1101_v59, %v1786_v13 }
 0x449   :  { %v1116_v62 = vrot.slane %v1102_v60, %v1786_v13 }
 0x44b   :  { %v1117_v63 = vcombine.low %v1109_v61, %v1116_v62 }
 0x44d   :  { %1121 = vst [vmem:[#allocation2 + $0x8] sm:$0xff] %v1117_v63 }
 0x44e   :  { %1550 = shalt.err (!%p1547_p12)
}
 0x44f   :  { %s1551_s23 = scalar_lea.hbm %s2221_s10, 256 }
 0x450   :  { %p1552_p13 = scmp.ne.s32.totalorder %s2221_s10, %s1551_s23  ;;  %p1555_p0 = scmp.lt.u32.totalorder %s1551_s23, %s2221_s10 }
 0x452   :  { %p1557_p1 = pnand %p1555_p0, %p1552_p13 }
 0x454   :  { %1560 = shalt.err (!%p1557_p1)
}
 0x455   :  { %1132 = dma.vmem_to_hbm [thread:$0]  %s1130_s11, 256, %s2221_s10, [#allocation3]  }
 0x456   :  { %1561 = dma.done.wait [#allocation3], 256  }
 0x457   :  { %1562 = vsyncadd [#allocation3], 4294967040 }
 0x458   :  { %1563 = dma.done.wait [#allocation5], 32  }
 0x459   :  { %1564 = vsyncadd [#allocation5], 4294967264 }
 0x45a   :  { %1149 = vsyncpa [#allocation3], 1 }
 0x45b   :  { %1150 = vsyncpa [#allocation5], 1 }

</bundles_post_ra>
